<compile_context>
chip_gen: v7x
topology: tpu7x:2x2x1
jax: 0.10.0
libtpu: 0.0.40
codegen_flags: <defaults>
</compile_context>

<pallas_src>
import functools

import jax
import jax.numpy as jnp
from jax.experimental import pallas as pl
from jax.experimental.pallas import tpu as pltpu


def make_divisible(value, divisor, min_value=None, min_ratio=0.9):
    if min_value is None:
        min_value = divisor
    new_value = max(min_value, int(value + divisor / 2) // divisor * divisor)
    if new_value < min_ratio * value:
        new_value += divisor
    return new_value


def _largest_divisor_leq(n, cap):
    cap = max(1, min(int(cap), int(n)))
    for d in range(cap, 0, -1):
        if n % d == 0:
            return d
    return 1


def _usable_vmem_bytes():
    # Per-generation scoped-VMEM budget: ~40 MiB on 64-MiB-VMEM chips (v7x),
    # up to ~96 MiB on 128-MiB chips (v5e/v6e). Conservative fallback if the
    # hardware query is unavailable.
    phys = 64 << 20
    try:
        info = pltpu.get_tpu_info()
        v = getattr(info, "vmem_capacity_bytes", None)
        if v:
            phys = int(v)
    except Exception:
        pass
    return (40 << 20) if phys <= (64 << 20) else (96 << 20)


def se_kernel(x_ref, w1_ref, b1_ref, w2_ref, b2_ref, o_ref, *, inv_hw):
    # x_ref: (Bt, C, HW)  w1: (C, Hmid)  b1: (1, Hmid)  w2: (Hmid, C)  b2: (1, C)
    #
    # Global average pool: f32 accumulation (per-vreg cast inside the reduce,
    # no persistent f32 copy of the tile), divide by the true H*W. The last
    # block dim is the full (possibly ragged) H*W, so the reduce sums exactly
    # the real columns.
    y = jnp.sum(x_ref[...].astype(jnp.float32), axis=-1) * inv_hw          # (Bt, C)

    # fc1 + ReLU (M = Bt rows on the MXU, bias folded into the dot epilogue).
    h = jnp.dot(y, w1_ref[...], preferred_element_type=jnp.float32) + b1_ref[...]
    h = jnp.maximum(h, 0.0)                                                 # (Bt, Hmid)

    # fc2 + HSigmoid: relu6(z + 3) / 6.
    z = jnp.dot(h, w2_ref[...], preferred_element_type=jnp.float32) + b2_ref[...]
    s = jnp.clip(z + 3.0, 0.0, 6.0) * (1.0 / 6.0)                           # (Bt, C)

    # Scale pass: fused load -> mul -> store. Keep the tile in its own dtype;
    # only the tiny gate s is cast (halves VPU work / vreg pressure for bf16).
    if o_ref.dtype == jnp.float32:
        o_ref[...] = x_ref[...] * s[:, :, None]
    else:
        o_ref[...] = x_ref[...] * s.astype(o_ref.dtype)[:, :, None]


def se_layer_pallas(x_nchw, w1, b1, w2, b2, *, target_block_bytes=4 << 20):
    B, C, H, W = x_nchw.shape
    HW = H * W
    hidden = w1.shape[1]

    # No spatial padding: the block's last two dims equal the full array dims,
    # so they are exempt from the (8,128) divisibility rule; a ragged HW only
    # costs a masked tail store per row (far cheaper than extra HBM passes).
    x3 = x_nchw.reshape(B, C, HW)

    itemsize = jnp.dtype(x_nchw.dtype).itemsize
    per_b_bytes = C * HW * itemsize
    usable_vmem = _usable_vmem_bytes()

    # Batch-block sizing:
    #   * ~target_block_bytes per step (amortize the ~0.35 us/step overhead),
    #   * fits the VMEM budget with double-buffered in + out (4x block),
    #   * >= min(B, 4) grid steps so both v7x TCs get >= 2 pipelined iterations,
    #   * bt divides B exactly (no batch padding / output slicing).
    bt_bytes = max(1, target_block_bytes // max(per_b_bytes, 1))
    bt_vmem = max(1, (usable_vmem - (4 << 20)) // (4 * max(per_b_bytes, 1)))
    min_steps = min(B, 4)
    bt_steps = max(1, B // min_steps)
    bt = max(1, min(B, bt_bytes, bt_vmem, bt_steps))
    bt = _largest_divisor_leq(B, bt)
    grid_b = B // bt

    # Weights / biases as small grid-invariant residents.
    w1_f = w1.astype(jnp.float32)
    w2_f = w2.astype(jnp.float32)
    b1_2d = b1.reshape(1, hidden).astype(jnp.float32)
    b2_2d = b2.reshape(1, C).astype(jnp.float32)

    # Explicit VMEM limit: double-buffered in + out blocks plus headroom for
    # the resident weights and Mosaic internal scratch, capped per generation.
    block_bytes = bt * per_b_bytes
    vmem_limit = int(min(max(4 * block_bytes + (4 << 20), 16 << 20), usable_vmem))

    kernel = functools.partial(se_kernel, inv_hw=1.0 / float(HW))

    out = pl.pallas_call(
        kernel,
        out_shape=jax.ShapeDtypeStruct((B, C, HW), x_nchw.dtype),
        grid_spec=pltpu.PrefetchScalarGridSpec(
            num_scalar_prefetch=0,
            grid=(grid_b,),
            in_specs=[
                pl.BlockSpec((bt, C, HW), lambda b: (b, 0, 0)),
                pl.BlockSpec((C, hidden), lambda b: (0, 0)),
                pl.BlockSpec((1, hidden), lambda b: (0, 0)),
                pl.BlockSpec((hidden, C), lambda b: (0, 0)),
                pl.BlockSpec((1, C), lambda b: (0, 0)),
            ],
            out_specs=pl.BlockSpec((bt, C, HW), lambda b: (b, 0, 0)),
        ),
        compiler_params=pltpu.CompilerParams(
            dimension_semantics=("parallel",),
            vmem_limit_bytes=vmem_limit,
        ),
    )(x3, w1_f, b1_2d, w2_f, b2_2d)

    return out.reshape(B, C, H, W)


def se_layer_ref(x_nchw, w1, b1, w2, b2):
    # Pure-JAX reference matching PyTorch SELayer semantics.
    y = jnp.mean(x_nchw.astype(jnp.float32), axis=(2, 3))        # (B, C)
    h = jnp.maximum(y @ w1 + b1, 0.0)                            # (B, hidden)
    z = h @ w2 + b2                                              # (B, C)
    s = jnp.clip(z + 3.0, 0.0, 6.0) / 6.0
    return (x_nchw.astype(jnp.float32) * s[:, :, None, None]).astype(x_nchw.dtype)


if __name__ == "__main__":
    key = jax.random.PRNGKey(0)
    kx1, kx2, kx3, k1, k2, k3, k4 = jax.random.split(key, 7)

    B, C = 2, 16
    reduction = 4
    hidden = make_divisible(C // reduction, 8)   # -> 8

    # Synthetic SE parameters (PyTorch Linear stores [out, in]; stored here
    # as [in, out] so y = x @ W + b).
    w1 = jax.random.normal(k1, (C, hidden), dtype=jnp.float32) * 0.1
    b1 = jax.random.normal(k2, (hidden,), dtype=jnp.float32) * 0.1
    w2 = jax.random.normal(k3, (hidden, C), dtype=jnp.float32) * 0.1
    b2 = jax.random.normal(k4, (C,), dtype=jnp.float32) * 0.1

    # Case 1: lane-aligned spatial size (16x16 = 256), f32.
    x_a = jax.random.normal(kx1, (B, C, 16, 16), dtype=jnp.float32)
    out_a = se_layer_pallas(x_a, w1, b1, w2, b2)
    jax.block_until_ready(out_a)
    ref_a = se_layer_ref(x_a, w1, b1, w2, b2)
    assert jnp.allclose(out_a, ref_a, atol=1e-5, rtol=1e-5), "mismatch (16x16 f32)"

    # Case 2: ragged spatial size (14x14 = 196, not a multiple of 128), f32.
    x_b = jax.random.normal(kx2, (B, C, 14, 14), dtype=jnp.float32)
    out_b = se_layer_pallas(x_b, w1, b1, w2, b2)
    jax.block_until_ready(out_b)
    ref_b = se_layer_ref(x_b, w1, b1, w2, b2)
    assert jnp.allclose(out_b, ref_b, atol=1e-5, rtol=1e-5), "mismatch (14x14 f32)"

    # Case 3: bf16 activations, tiny ragged spatial (7x7 = 49), B=4 so the
    # grid has >= 4 steps and both v7x TCs pipeline.
    x_c = jax.random.normal(kx3, (4, C, 7, 7), dtype=jnp.float32).astype(jnp.bfloat16)
    out_c = se_layer_pallas(x_c, w1, b1, w2, b2)
    jax.block_until_ready(out_c)
    ref_c = se_layer_ref(x_c, w1, b1, w2, b2)
    assert jnp.allclose(out_c.astype(jnp.float32), ref_c.astype(jnp.float32),
                        atol=2e-2, rtol=2e-2), "mismatch (7x7 bf16)"

    print("KERNEL_OK")
</pallas_src>

<mosaic_0001>
module attributes {stable_mosaic.version = 11 : i64} {
  func.func @se_kernel(%arg0: i32, %arg1: memref<1x16x256xf32, #tpu.memory_space<vmem>>, %arg2: memref<16x8xf32, #tpu.memory_space<vmem>>, %arg3: memref<1x8xf32, #tpu.memory_space<vmem>>, %arg4: memref<8x16xf32, #tpu.memory_space<vmem>>, %arg5: memref<1x16xf32, #tpu.memory_space<vmem>>, %arg6: memref<1x16x256xf32, #tpu.memory_space<vmem>>) attributes {dimension_semantics = [#tpu.dimension_semantics<parallel>], iteration_bounds = array<i64: 2>, scalar_prefetch = 0 : i64, scratch_operands = 0 : i64, tpu.core_type = #tpu.core_type<tc>, window_params = [{transform_indices = @transform_0, window_bounds = array<i64: 1, 16, 256>}, {pipeline_mode = #tpu.pipeline_mode<synchronous>, transform_indices = @transform_1, window_bounds = array<i64: 16, 8>}, {pipeline_mode = #tpu.pipeline_mode<synchronous>, transform_indices = @transform_2, window_bounds = array<i64: 1, 8>}, {pipeline_mode = #tpu.pipeline_mode<synchronous>, transform_indices = @transform_3, window_bounds = array<i64: 8, 16>}, {pipeline_mode = #tpu.pipeline_mode<synchronous>, transform_indices = @transform_4, window_bounds = array<i64: 1, 16>}, {transform_indices = @transform_5, window_bounds = array<i64: 1, 16, 256>}]} {
    %c0 = arith.constant 0 : index
    %c0_0 = arith.constant 0 : index
    %c0_1 = arith.constant 0 : index
    %0 = vector.load %arg1[%c0, %c0_0, %c0_1] : memref<1x16x256xf32, #tpu.memory_space<vmem>>, vector<1x16x256xf32>
    %cst = arith.constant dense<0.000000e+00> : vector<1x16xf32>
    %1 = vector.multi_reduction <add>, %0, %cst [2] : vector<1x16x256xf32> to vector<1x16xf32>
    %cst_2 = arith.constant 3.906250e-03 : f32
    %2 = vector.broadcast %cst_2 : f32 to vector<1x16xf32>
    %3 = arith.mulf %1, %2 : vector<1x16xf32>
    %c0_3 = arith.constant 0 : index
    %c0_4 = arith.constant 0 : index
    %4 = vector.load %arg2[%c0_3, %c0_4] : memref<16x8xf32, #tpu.memory_space<vmem>>, vector<16x8xf32>
    %cst_5 = arith.constant dense<0.000000e+00> : vector<1x8xf32>
    %5 = tpu.matmul %3, %4, %cst_5 {dimension_numbers = #tpu.dot_dimension_numbers<[1], [0], [0], [1], [0, 0, 1, 1], [], []>} : vector<1x16xf32>, vector<16x8xf32>, vector<1x8xf32> -> vector<1x8xf32>
    %c0_6 = arith.constant 0 : index
    %c0_7 = arith.constant 0 : index
    %6 = vector.load %arg3[%c0_6, %c0_7] : memref<1x8xf32, #tpu.memory_space<vmem>>, vector<1x8xf32>
    %7 = arith.addf %5, %6 : vector<1x8xf32>
    %cst_8 = arith.constant 0.000000e+00 : f32
    %8 = vector.broadcast %cst_8 : f32 to vector<1x8xf32>
    %9 = arith.maximumf %7, %8 : vector<1x8xf32>
    %c0_9 = arith.constant 0 : index
    %c0_10 = arith.constant 0 : index
    %10 = vector.load %arg4[%c0_9, %c0_10] : memref<8x16xf32, #tpu.memory_space<vmem>>, vector<8x16xf32>
    %cst_11 = arith.constant dense<0.000000e+00> : vector<1x16xf32>
    %11 = tpu.matmul %9, %10, %cst_11 {dimension_numbers = #tpu.dot_dimension_numbers<[1], [0], [0], [1], [0, 0, 1, 1], [], []>} : vector<1x8xf32>, vector<8x16xf32>, vector<1x16xf32> -> vector<1x16xf32>
    %c0_12 = arith.constant 0 : index
    %c0_13 = arith.constant 0 : index
    %12 = vector.load %arg5[%c0_12, %c0_13] : memref<1x16xf32, #tpu.memory_space<vmem>>, vector<1x16xf32>
    %13 = arith.addf %11, %12 : vector<1x16xf32>
    %cst_14 = arith.constant 3.000000e+00 : f32
    %14 = vector.broadcast %cst_14 : f32 to vector<1x16xf32>
    %15 = arith.addf %13, %14 : vector<1x16xf32>
    %cst_15 = arith.constant 0.000000e+00 : f32
    %cst_16 = arith.constant 6.000000e+00 : f32
    %16 = vector.broadcast %cst_15 : f32 to vector<1x16xf32>
    %17 = arith.maximumf %16, %15 : vector<1x16xf32>
    %18 = vector.broadcast %cst_16 : f32 to vector<1x16xf32>
    %19 = arith.minimumf %18, %17 : vector<1x16xf32>
    %cst_17 = arith.constant 0.166666672 : f32
    %20 = vector.broadcast %cst_17 : f32 to vector<1x16xf32>
    %21 = arith.mulf %19, %20 : vector<1x16xf32>
    %c0_18 = arith.constant 0 : index
    %c0_19 = arith.constant 0 : index
    %c0_20 = arith.constant 0 : index
    %22 = vector.load %arg1[%c0_18, %c0_19, %c0_20] : memref<1x16x256xf32, #tpu.memory_space<vmem>>, vector<1x16x256xf32>
    %23 = vector.shape_cast %21 : vector<1x16xf32> to vector<1x16x1xf32>
    %24 = vector.broadcast %23 : vector<1x16x1xf32> to vector<1x16x256xf32>
    %25 = arith.mulf %22, %24 : vector<1x16x256xf32>
    %c0_21 = arith.constant 0 : index
    %c0_22 = arith.constant 0 : index
    %c0_23 = arith.constant 0 : index
    %26 = vector.load %arg6[%c0_21, %c0_22, %c0_23] : memref<1x16x256xf32, #tpu.memory_space<vmem>>, vector<1x16x256xf32>
    tpu.vector_store %arg6[%c0_21, %c0_22, %c0_23], %25 {strides = array<i32>} : memref<1x16x256xf32, #tpu.memory_space<vmem>>, vector<1x16x256xf32>,
    return
  }
  func.func @transform_0(%arg0: i32) -> (i32, i32, i32) {
    %c0_i32 = arith.constant 0 : i32
    %c0_i32_0 = arith.constant 0 : i32
    %c0_i32_1 = arith.constant 0 : i32
    return %arg0, %c0_i32, %c0_i32_0 : i32, i32, i32
  }
  func.func @transform_1(%arg0: i32) -> (i32, i32) {
    %c0_i32 = arith.constant 0 : i32
    %c0_i32_0 = arith.constant 0 : i32
    %c0_i32_1 = arith.constant 0 : i32
    return %c0_i32, %c0_i32_0 : i32, i32
  }
  func.func @transform_2(%arg0: i32) -> (i32, i32) {
    %c0_i32 = arith.constant 0 : i32
    %c0_i32_0 = arith.constant 0 : i32
    %c0_i32_1 = arith.constant 0 : i32
    return %c0_i32, %c0_i32_0 : i32, i32
  }
  func.func @transform_3(%arg0: i32) -> (i32, i32) {
    %c0_i32 = arith.constant 0 : i32
    %c0_i32_0 = arith.constant 0 : i32
    %c0_i32_1 = arith.constant 0 : i32
    return %c0_i32, %c0_i32_0 : i32, i32
  }
  func.func @transform_4(%arg0: i32) -> (i32, i32) {
    %c0_i32 = arith.constant 0 : i32
    %c0_i32_0 = arith.constant 0 : i32
    %c0_i32_1 = arith.constant 0 : i32
    return %c0_i32, %c0_i32_0 : i32, i32
  }
  func.func @transform_5(%arg0: i32) -> (i32, i32, i32) {
    %c0_i32 = arith.constant 0 : i32
    %c0_i32_0 = arith.constant 0 : i32
    %c0_i32_1 = arith.constant 0 : i32
    return %arg0, %c0_i32, %c0_i32_0 : i32, i32, i32
  }
}

</mosaic_0001>

<bundles_post_ra>
// kernel: tpu_custom_call.1
= control target key start
LH: loop header
LB: loop body
LE: loop exit
PB: predicated region body
PF: predicated region fallthrough
CT: control target
= control target key end

     0   :  { %10 = vsyncpa [#allocation3], 0  ;;  %s950_s0 = inlined_call_operand.hbm [shape: f32[2,16,256], index: 0, kind: input, shape index: {}]   ;;  %s951_s1 = inlined_call_operand.vmem [shape: f32[16,8], index: 1, kind: input, shape index: {}]   ;;  %s952_s2 = inlined_call_operand.vmem [shape: f32[1,8], index: 2, kind: input, shape index: {}]   ;;  %s953_s3 = inlined_call_operand.vmem [shape: f32[8,16], index: 3, kind: input, shape index: {}]   ;;  %s954_s4 = inlined_call_operand.vmem [shape: f32[1,16], index: 4, kind: input, shape index: {}]   ;;  %s955_s5 = inlined_call_operand.hbm [shape: f32[2,16,256], index: 5, kind: output, shape index: {}]  }
   0x1   :  { %12 = vsyncpa [#allocation3 + $0x1], 0 }
   0x2   :  { %13 = vsyncpa [#allocation4], 0 }
   0x3   :  { %15 = vsyncpa [#allocation4 + $0x1], 0  ;;  %s761_s18 = smov 0   ;;  %s763_s19 = smov 0  }
   0x4   :  { %s765_s20 = smov 0   ;;  %s767_s21 = smov 0  }
   0x5 LB: > { %s782_s22 = sadd.s32 4294967295, %s720_s21   ;;  %s533_s23 = sadd.s32 4294967294, %s720_s21   ;;  %s720_s21 = sphi %s767_s21, %s968_s21   ;;  %s716_s20 = sphi %s765_s20, %s967_s20   ;;  %s712_s19 = sphi %s763_s19, %s966_s19   ;;  %s708_s18 = sphi %s761_s18, %s965_s18  }
   0x6   : > { %s786_s24 = sadd.s32 1, %s720_s21   ;;  %s28_s25 = sadd.s32 1, %s716_s20 }
   0x7   : > { %s25_s26 = ssub.s32 %s720_s21, %s786_s24  ;;  %p35_p0 = scmp.ne.s32.totalorder %s716_s20, %s712_s19 }
   0x8   : > { %p26_p1 = scmp.eq.s32.totalorder %s25_s26, 0  ;;  %p36_p2 = scmp.eq.s32.totalorder %s720_s21, 0 }
   0x9   : > { %p41_p3 = scmp.ne.s32.totalorder %s712_s19, %s708_s18  ;;  %p42_p4 = scmp.eq.s32.totalorder %s782_s22, 0 }
   0xa   : > { %s798_s27 = scalar_select %p26_p1, %s716_s20, %s28_s25  }
   0xb   : > { %p800_p5 = por %p36_p2, %p35_p0  ;;  %p804_p6 = por %p42_p4, %p41_p3 }
   0xc   : > { %p149_p7 = scmp.eq.s32.totalorder %s782_s22, 1  ;;  %p155_p8 = scmp.eq.s32.totalorder %s533_s23, 1 }
   0xd   : > { %p583_p10 = scmp.lt.s32.totalorder %s720_s21, 2  ;;  %s187_s7 = sand.u32 1, %s716_s20  }
   0xe   : > { %p811_p11 = por %p149_p7, %p35_p0  ;;  %p815_p12 = por %p155_p8, %p41_p3 }
   0xf   : > { %s549_s8 = sshll.u32 %s720_s21, 9  ;;  %s536_s9 = sshll.u32 %s187_s7, 5 }
  0x10   : > { %s959_s30 = scalar_select %p811_p11, 1, 0 }
  0x11   : > { %s960_s6 = scalar_select %p815_p12, 1, 0 }
  0x12   : > { %s824_s12 = scalar_lea.hbm %s950_s0, %s549_s8  ;;  %s191_s13 = scalar_lea.vmem [#allocation2], %s536_s9 }
  0x13   : > { %s198_s14 = sshll.u32 %s191_s13, 4  ;;  %p828_p13 = pnand %p583_p10, %p800_p5  ;;  %s832_s14 = int_to_ptr.vmem [resolvable:$true] %s198_s14 }
  0x14   : > { %s834_s16 = scalar_lea.sflag [#allocation3], %s187_s7  ;;  %s624_s17 = scalar_lea.hbm %s824_s12, 512 }
  0x15   : > { %p625_p0 = scmp.ne.s32.totalorder %s824_s12, %s624_s17  ;;  %p626_p1 = pneg %p828_p13 }
  0x16   : > { %s629_s26 = scalar_lea.hbm %s950_s0, 1024  ;;  %p630_p4 = scmp.lt.u32.totalorder %s824_s12, %s950_s0 }
  0x17   : > { %p627_p2 = pnand %p626_p1, %p625_p0  ;;  %p631_p5 = scmp.lt.u32.totalorder %s629_s26, %s624_s17 }
  0x18   : > { %p633_p8 = scmp.lt.u32.totalorder %s624_s17, %s824_s12 }
  0x19   : > { %p628_p3 = pneg %p627_p2  ;;  %p632_p7 = por %p631_p5, %p630_p4 }
  0x1b   : > { %p634_p10 = por %p633_p8, %p632_p7 }
  0x1d   : > { %p635_p9 = pnand %p634_p10, %p628_p3 }
  0x1f   : > { %638 = shalt.err (!%p635_p9)
}
  0x20   : > { %s639_s7 = scalar_lea.vmem %s832_s14, 512  ;;  %s722_s9 = smov [#allocation2]  }
  0x21   : > { %p640_p0 = scmp.ne.s32.totalorder %s832_s14, %s639_s7  ;;  %s644_s10 = sshll.u32 %s722_s9, 4  ;;  %s645_s10 = int_to_ptr.vmem [resolvable:$false] %s644_s10 }
  0x22   : > { %s646_s11 = scalar_lea.vmem %s645_s10, 1024  ;;  %p647_p11 = scmp.lt.s32.totalorder %s832_s14, %s645_s10 }
  0x23   : > { %p642_p2 = pnand %p640_p0, %p626_p1  ;;  %p648_p4 = scmp.lt.s32.totalorder %s646_s11, %s639_s7 }
  0x25   : > { %p643_p12 = pneg %p642_p2  ;;  %p649_p5 = por %p648_p4, %p647_p11 }
  0x27   : > { %p650_p7 = pnand %p649_p5, %p643_p12 }
  0x29   : > { %653 = shalt.err (!%p650_p7)
}
  0x2a   : > { %s723_s13 = smov 256   ;;  %s724_s17 = smov 16  }
  0x2b   : > { %578 = dma.hbm_to_vmem [thread:$0]  (!%p828_p13), %s824_s12, 512, %s832_s14, %s834_s16, %s723_s13, %s723_s13, %s724_s17  }
  0x2c   : > { %p539_p9 = scmp.ge.s32.totalorder %s720_s21, 1  ;;  %p206_p1 = scmp.lt.s32.totalorder %s720_s21, 3 }
  0x2e   : > { %p207_p3 = pnand %p539_p9, %p206_p1 }
  0x2f   : > { %s865_s23 = sand.u32 (!%p207_p3), 1, %s712_s19  }
  0x30   : > { %210 = sbr.rel (%p207_p3) target bundleno = 786 (0x312), region = 40  ;;  %s540_s25 = sshll.u32 (!%p207_p3), %s865_s23, 5 }
  0x31   : > { %s213_s26 = scalar_lea.sflag (!%p207_p3), [#allocation3], %s865_s23  ;;  %s216_s28 = scalar_lea.vmem (!%p207_p3), [#allocation2], %s540_s25 }
  0x37   : > { %699 = dma.done.wait (%p804_p6), %s213_s26, 512  }
  0x38   : > { %701 = vsyncadd (%p804_p6), %s213_s26, 4294966784  ;;  %v243_v0 = vld [vmem:[%s216_s28] sm:$0xff]  ;;  %v244_v1 = vld [vmem:[%s216_s28 + $0x8] sm:$0xff]  ;;  %v725_v9 = vmov 0.0|0.0   ;;  %vm726_vm0 = vmmov 0   ;;  %v727_v10 = vmov 0.0   ;;  %v260_v11 = vlaneseq }
  0x39   : > { %v875_v2 = vld [vmem:[%s216_s28 + $0x10] sm:$0xff]  ;;  %v247_v3 = vadd.f32 %v244_v1, %v243_v0  ;;  %v877_v4 = vld [vmem:[%s216_s28 + $0x18] sm:$0xff]  ;;  %v255_v6 = vld [vmem:[%s951_s1] sm:$0xff]  ;;  %568 = vmatprep.subr.bf16.mxu0 %v725_v9  ;;  %560 = vmatprep.mubr.msk.f32.mxu0 %vm726_vm0, %v727_v10  ;;  %vm271_vm1 = vcmask 130112   ;;  %vm273_vm2 = vcmask 130048   ;;  %vm349_vm3 = vcmask 64512  }
  0x3a   : > { %v250_v5 = vadd.f32 %v877_v4, %v875_v2  ;;  %v256_v7 = vld [vmem:[%s951_s1 + $0x8] sm:$0xff]  ;;  %563 = vmatprep.subr.mxu1 %v727_v10  ;;  %565 = vmatprep.mubr.msk.f32.mxu1 %vm726_vm0, %v727_v10  ;;  %v261_v12 = vand.u32 127, %v260_v11  ;;  %v263_v13 = vshrl.u32 %v260_v11, 7  ;;  %v347_v24 = vld [vmem:[%s953_s3] sm:$0xff]  ;;  %s242_s13 = scalar_lea.vmem [#allocation5], %s540_s25  ;;  %s550_s26 = sshll.u32 %s782_s22, 9 }
  0x3b   : > { %248 = vadd.xlane.f32.xlu0 %v247_v3  ;;  %v569_v8 = vpack.c.bf16 %v256_v7, %v255_v6  ;;  %564 = vmatpush3.msra.mxu1 %v347_v24  ;;  %v257_v25 = vld [vmem:[%s952_s2] sm:$0x1]  ;;  %s460_s17 = sshll.u32 %s242_s13, 4  ;;  %s904_s14 = scalar_lea.hbm %s955_s5, %s550_s26  ;;  %s899_s17 = int_to_ptr.vmem [resolvable:$true] %s460_s17 }
  0x3c   : > { %v266_v14 = vadd.s32 4294967288, %v261_v12  ;;  %v264_v16 = vsub.s32 %v261_v12, %v263_v13  ;;  %v348_v30 = vld [vmem:[%s954_s4] sm:$0x1]  ;;  %v429_v37 = vsub.s32 0, %v263_v13  ;;  %s447_s22 = scalar_lea.sflag [#allocation4], %s865_s23  ;;  %s654_s25 = scalar_lea.vmem %s899_s17, 512 }
  0x3d   : > { %570 = vmatpush3.bf16.msra.mxu0 %v569_v8  ;;  %p655_p6 = scmp.ne.s32.totalorder %s899_s17, %s654_s25  ;;  %p962_p11 = scmp.ne.s32.totalorder %s959_s30, 0 }
  0x3e   : > { %v269_v18 = vsub.s32 %v266_v14, %v263_v13  ;;  %s728_s15 = smov [#allocation5]  }
  0x3f   : > { %251 = vadd.xlane.f32.xlu0 %v250_v5  ;;  %p656_p12 = pnand %p655_p6, %p962_p11  ;;  %s658_s16 = sshll.u32 %s728_s15, 4  ;;  %s659_s16 = int_to_ptr.vmem [resolvable:$false] %s658_s16 }
  0x40   : > { %s660_s29 = scalar_lea.vmem %s659_s16, 1024  ;;  %p661_p8 = scmp.lt.s32.totalorder %s899_s17, %s659_s16 }
  0x41   : > { %p657_p13 = pneg %p656_p12  ;;  %p662_p10 = scmp.lt.s32.totalorder %s660_s29, %s654_s25 }
  0x43   : > { %p663_p0 = por %p662_p10, %p661_p8 }
  0x45   : > { %p664_p2 = pnand %p663_p0, %p657_p13 }
  0xc8   : > { %v249_v15 = vpop.xlane.xlu0 %248 }
  0xc9   : > { %v253_v17 = vmul.f32 0.00390625, %v249_v15 }
  0xcb   : > { %v265_v21 = vrot.slane %v253_v17, %v264_v16 }
  0xcc   : > { %v252_v19 = vpop.xlane.xlu0 %251 }
  0xcd   : > { %v254_v20 = vmul.f32 0.00390625, %v252_v19 }
  0xcf   : > { %v270_v22 = vrot.slane %v254_v20, %v269_v18 }
  0xd1   : > { %v272_v23 = vsel %vm271_vm1, %v270_v22, %v265_v21 }
  0xd2   : > { %561 = vmatmul.mubr.msk.f32.vlgmr.msra.gmra.mrb[0].mxu0 %vm273_vm2, %v272_v23 }
 0x1a5   : > { %v342_v26 = vpop.f32.mrb[0].mxu0 }
 0x1a6   : > { %v343_v27 = vadd.f32 %v342_v26, %v257_v25  ;;  %v562_v28 = vpop.f32.mrb[1].mxu0 }
 0x1a8   : > { %v346_v29 = vmax.f32 %v343_v27, 0.0 }
 0x1aa   : > { %566 = vmatmul.mubr.msk.f32.vlgmr.msra.gmra.mrb[0].mxu1 %vm349_vm3, %v346_v29 }
 0x27d   : > { %v419_v31 = vpop.f32.mrb[0].mxu1 }
 0x27e   : > { %v420_v32 = vadd.f32 %v419_v31, %v348_v30  ;;  %v567_v33 = vpop.f32.mrb[1].mxu1 }
 0x280   : > { %v423_v34 = vadd.f32 3.0, %v420_v32 }
 0x282   : > { %v424_v35 = vmax.f32 %v423_v34, 0.0 }
 0x284   : > { %v425_v36 = vmin.f32 %v424_v35, 6.0 }
 0x286   : > { %v426_v38 = vmul.f32 0.16666667, %v425_v36 }
 0x288   : > { %v430_v39 = vrot.slane %v426_v38, %v429_v37 }
 0x28a   : > { %432 = vbcast.lane.b32.xlu1 %v430_v39, 256 }
 0x28e   : > { %436 = vbcast.lane.b32.xlu1 %v430_v39, 264 }
 0x2fc   : > { %v433_v40 = vpop.permute.xlu1 %432 }
 0x2fd   : > { %v438_v41 = vmul.f32 %v433_v40, %v243_v0  ;;  %v439_v42 = vmul.f32 %v433_v40, %v244_v1 }
 0x2ff   : > { %442 = vst [vmem:[%s242_s13] sm:$0xff] %v438_v41  ;;  %443 = vst [vmem:[%s242_s13 + $0x8] sm:$0xff] %v439_v42 }
 0x300   : > { %v437_v43 = vpop.permute.xlu1 %436 }
 0x301   : > { %v440_v44 = vmul.f32 %v437_v43, %v875_v2  ;;  %v441_v45 = vmul.f32 %v437_v43, %v877_v4 }
 0x303   : > { %444 = vst [vmem:[%s242_s13 + $0x10] sm:$0xff] %v440_v44  ;;  %445 = vst [vmem:[%s242_s13 + $0x18] sm:$0xff] %v441_v45 }
 0x304   : > { %667 = shalt.err (!%p664_p2)
}
 0x305   : > { %s668_s8 = scalar_lea.hbm %s904_s14, 512  ;;  %s672_s10 = scalar_lea.hbm %s955_s5, 1024 }
 0x306   : > { %p669_p4 = scmp.ne.s32.totalorder %s904_s14, %s668_s8  ;;  %p673_p9 = scmp.lt.u32.totalorder %s904_s14, %s955_s5 }
 0x307   : > { %p674_p1 = scmp.lt.u32.totalorder %s672_s10, %s668_s8  ;;  %p676_p6 = scmp.lt.u32.totalorder %s668_s8, %s904_s14 }
 0x308   : > { %p670_p5 = pnand %p669_p4, %p962_p11 }
 0x309   : > { %p675_p3 = por %p674_p1, %p673_p9 }
 0x30a   : > { %p671_p7 = pneg %p670_p5 }
 0x30b   : > { %p677_p12 = por %p676_p6, %p675_p3 }
 0x30d   : > { %p678_p13 = pnand %p677_p12, %p671_p7 }
 0x30f   : > { %681 = shalt.err (!%p678_p13)
}
 0x310   : > { %s729_s26 = smov 256   ;;  %s730_s28 = smov 16  }
 0x311   : > { %573 = dma.vmem_to_hbm [thread:$0]  (%p962_p11), %s899_s17, 512, %s904_s14, %s447_s22, %s729_s26, %s729_s26, %s730_s28  }
 0x312 PF: > { %s475_s12 = sand.u32 1, %s708_s18   ;;  %p963_p8 = scmp.ne.s32.totalorder %s960_s6, 0 }
 0x313   : > { %p964_p10 = scmp.ge.s32.totalorder %s720_s21, 2  ;;  %s476_s25 = scalar_lea.sflag [#allocation4], %s475_s12 }
 0x315   : > { %p580_p0 = pnand %p964_p10, %p963_p8 }
 0x317   : > { %703 = dma.done.wait (!%p580_p0), %s476_s25, 512  }
 0x318   : > { %705 = vsyncadd (!%p580_p0), %s476_s25, 4294966784  ;;  %p18_p2 = scmp.ge.s32.totalorder %s786_s24, 4   ;;  %s965_s18 = smov %s712_s19 }
 0x319   : > { %s966_s19 = smov %s716_s20  ;;  %s967_s20 = smov %s798_s27 }
 0x31a   : > { %s968_s21 = smov %s786_s24  ;;  %20 = sbr.rel (!%p18_p2) target bundleno = 5 (0x5), region = 85 }
 0x321   :  { %481 = vsyncpa [#allocation3], 1 }
 0x322   :  { %483 = vsyncpa [#allocation3 + $0x1], 1 }
 0x323   :  { %484 = vsyncpa [#allocation4], 1 }
 0x324   :  { %486 = vsyncpa [#allocation4 + $0x1], 1 }

</bundles_post_ra>
